<compile_context>
chip_gen: v7x
topology: tpu7x:2x2x1
jax: 0.10.0
libtpu: 0.0.40
codegen_flags: <defaults>
</compile_context>

<pallas_src>
import functools

import jax
import jax.numpy as jnp
from jax.experimental import pallas as pl
from jax.experimental.pallas import tpu as pltpu

_LANES = 128
_SUBLANES = 8
_MAX_BLOCK_ROWS = 8192          # 8192 x 128 f32 = 4 MiB per input block
_CHUNK_ROWS = 128               # inner fori_loop sub-chunk (16 f32 vregs / operand)
_VMEM_LIMIT_BYTES = 32 * 1024 * 1024


def _bce_dice_kernel(x_ref, y_ref, o_ref, acc_ref, *, n_elems, block_rows, chunk_rows):
    i = pl.program_id(0)          # core-split axis ("parallel")
    k = pl.program_id(1)          # sequential row-block axis ("arbitrary")
    kmax = pl.num_programs(1)

    @pl.when(k == 0)
    def _init():
        acc_ref[...] = jnp.zeros_like(acc_ref)

    block_elems = block_rows * _LANES
    lb = i * kmax + k             # logical (un-clamped) block id
    base = lb * block_elems       # global element index of this block's start

    n_full = block_rows // chunk_rows
    tail_rows = block_rows - n_full * chunk_rows

    def chunk_partials(elem_base, x, y, masked):
        if masked:
            row_ids = jax.lax.broadcasted_iota(jnp.int32, x.shape, 0)
            lane_ids = jax.lax.broadcasted_iota(jnp.int32, x.shape, 1)
            valid = (elem_base + row_ids * _LANES + lane_ids) < n_elems
            # logit=-1e9 (exp underflows to 0), target=0 -> exact 0 in all sums.
            x = jnp.where(valid, x, -1e9)
            y = jnp.where(valid, y, 0.0)
        # Numerically-stable BCE-with-logits (matches torch.nn.BCEWithLogitsLoss):
        #   max(x, 0) - x*y + log(1 + exp(-|x|))
        e = jnp.exp(-jnp.abs(x))               # shared by BCE and sigmoid
        d = 1.0 + e
        bce = jnp.maximum(x, 0.0) - x * y + jnp.log(d)
        # EUP approx reciprocal + one Newton refinement (error ~2^-24).
        r = pl.reciprocal(d, approx=True)
        r = r * (2.0 - d * r)
        sig = jnp.where(x >= 0.0, r, e * r)    # sigmoid(x)
        shp = (x.shape[0] // _SUBLANES, _SUBLANES, _LANES)
        return (jnp.sum(bce.reshape(shp), axis=0),
                jnp.sum(sig.reshape(shp), axis=0),
                jnp.sum(y.reshape(shp), axis=0),
                jnp.sum((sig * y).reshape(shp), axis=0))

    def load(r0, nrows):
        x = x_ref[pl.ds(r0, nrows), :].astype(jnp.float32)
        y = y_ref[pl.ds(r0, nrows), :].astype(jnp.float32)
        return x, y

    def accumulate(masked):
        zeros = (jnp.zeros((_SUBLANES, _LANES), jnp.float32),) * 4

        def body(c, carry):
            r0 = pl.multiple_of(c * chunk_rows, chunk_rows)
            x, y = load(r0, chunk_rows)
            p = chunk_partials(base + r0 * _LANES, x, y, masked)
            return tuple(a + b for a, b in zip(carry, p))

        if n_full > 0:
            carry = jax.lax.fori_loop(0, n_full, body, zeros)
        else:
            carry = zeros

        if tail_rows:                                   # static Python remainder
            r0 = n_full * chunk_rows
            x, y = load(r0, tail_rows)
            p = chunk_partials(base + r0 * _LANES, x, y, masked)
            carry = tuple(a + b for a, b in zip(carry, p))

        for q in range(4):
            acc_ref[q] += carry[q]

    # Interior fast path: whole block is in range -> zero mask work.
    @pl.when(base + block_elems <= n_elems)
    def _interior():
        accumulate(masked=False)

    # Boundary path (at most once per core): ragged tail of the last real block.
    @pl.when((base < n_elems) & (base + block_elems > n_elems))
    def _boundary():
        accumulate(masked=True)

    # Phantom blocks (base >= n_elems, from the core split) skip all compute;
    # only their clamped re-DMA of the last block remains.

    @pl.when(k == kmax - 1)
    def _finalize():
        o_ref[0] = acc_ref[...]   # lane-dense (4, 8, 128) store per core


def _num_grid_cores():
    """2-way core split only pays off on dual-TensorCore chips (v7x)."""
    try:
        kind = jax.devices()[0].device_kind.lower()
    except Exception:
        return 2
    return 2 if ("v7" in kind or "7x" in kind) else 1


def bce_dice_loss(inputs, targets, loss_params=(1.0, 1.0), epsilon=1e-6, n_cores=None):
    """Combined BCEWithLogits + Dice loss. `inputs` are logits, `targets` in {0,1}."""
    n = int(inputs.size)
    if n_cores is None:
        n_cores = _num_grid_cores()

    x = inputs.reshape(-1)
    y = targets.reshape(-1)

    # Pad only to a full (8,128) row-tile (< 1024 elems); typical NCHW sizes are
    # already multiples of 1024 so this is a free reshape with no extra HBM pass.
    tile = _SUBLANES * _LANES
    rem = (-n) % tile
    if rem:
        x = jnp.pad(x, (0, rem))
        y = jnp.pad(y, (0, rem))
    rows = (n + rem) // _LANES            # multiple of 8
    x2 = x.reshape(rows, _LANES)
    y2 = y.reshape(rows, _LANES)

    block_rows = min(_MAX_BLOCK_ROWS, rows)       # never larger than the array
    chunk_rows = min(_CHUNK_ROWS, block_rows)     # multiple of 8
    num_blocks = pl.cdiv(rows, block_rows)
    kmax = pl.cdiv(num_blocks, n_cores)
    grid = (n_cores, kmax)

    def in_map(i, k):
        # Clamp so phantom-block DMAs stay in bounds; their compute is skipped.
        return (jnp.minimum(i * kmax + k, num_blocks - 1), 0)

    kernel = functools.partial(
        _bce_dice_kernel,
        n_elems=n,
        block_rows=block_rows,
        chunk_rows=chunk_rows,
    )

    bytes_accessed = (x2.size * x2.dtype.itemsize
                      + y2.size * y2.dtype.itemsize
                      + n_cores * 4 * _SUBLANES * _LANES * 4)

    partials = pl.pallas_call(
        kernel,
        out_shape=jax.ShapeDtypeStruct((n_cores, 4, _SUBLANES, _LANES), jnp.float32),
        grid_spec=pltpu.PrefetchScalarGridSpec(
            num_scalar_prefetch=0,
            grid=grid,
            in_specs=[
                pl.BlockSpec((block_rows, _LANES), in_map),
                pl.BlockSpec((block_rows, _LANES), in_map),
            ],
            out_specs=pl.BlockSpec((1, 4, _SUBLANES, _LANES), lambda i, k: (i, 0, 0, 0)),
            scratch_shapes=[pltpu.VMEM((4, _SUBLANES, _LANES), jnp.float32)],
        ),
        compiler_params=pltpu.CompilerParams(
            dimension_semantics=("parallel", "arbitrary"),
            vmem_limit_bytes=_VMEM_LIMIT_BYTES,
        ),
        cost_estimate=pl.CostEstimate(
            flops=18 * n,
            transcendentals=3 * n,
            bytes_accessed=bytes_accessed,
        ),
    )(x2, y2)

    # Tiny final combine in plain JAX: 4 global sums -> scalar loss.
    sums = jnp.sum(partials, axis=(0, 2, 3))  # [sum_bce, sum_sig, sum_targets, sum_intersection]
    bce_mean = sums[0] / n
    dice_coeff = (2.0 * sums[3] + epsilon) / (sums[1] + sums[2] + epsilon)
    dice = 1.0 - dice_coeff
    return loss_params[0] * bce_mean + loss_params[1] * dice


def _reference_bce_dice(inputs, targets, loss_params=(1.0, 1.0), epsilon=1e-6):
    x = inputs.astype(jnp.float32)
    y = targets.astype(jnp.float32)
    bce = jnp.mean(jnp.maximum(x, 0.0) - x * y + jnp.log1p(jnp.exp(-jnp.abs(x))))
    sig = jax.nn.sigmoid(x)
    intersection = jnp.sum(sig * y)
    dice_coeff = (2.0 * intersection + epsilon) / (jnp.sum(sig) + jnp.sum(y) + epsilon)
    dice = 1.0 - dice_coeff
    return loss_params[0] * bce + loss_params[1] * dice


if __name__ == "__main__":
    key = jax.random.PRNGKey(0)
    k_x, k_y = jax.random.split(key)
    # NCHW-shaped synthetic segmentation logits / binary targets.
    shape = (2, 4, 16, 16)
    inputs = jax.random.normal(k_x, shape, dtype=jnp.float32)
    targets = (jax.random.uniform(k_y, shape) > 0.5).astype(jnp.float32)

    loss = bce_dice_loss(inputs, targets, loss_params=(1.0, 1.0))
    loss = jax.block_until_ready(loss)

    ref = _reference_bce_dice(inputs, targets, loss_params=(1.0, 1.0))
    assert jnp.allclose(loss, ref, rtol=1e-5, atol=1e-5), (loss, ref)

    print("KERNEL_OK")
</pallas_src>

<mosaic_0001>
module attributes {stable_mosaic.version = 11 : i64} {
  func.func @_bce_dice_kernel(%arg0: i32, %arg1: i32, %arg2: memref<16x128xf32, #tpu.memory_space<vmem>>, %arg3: memref<16x128xf32, #tpu.memory_space<vmem>>, %arg4: memref<1x4x8x128xf32, #tpu.memory_space<vmem>>, %arg5: memref<4x8x128xf32, #tpu.memory_space<vmem>>) attributes {dimension_semantics = [#tpu.dimension_semantics<parallel>, #tpu.dimension_semantics<arbitrary>], iteration_bounds = array<i64: 1, 1>, scalar_prefetch = 0 : i64, scratch_operands = 1 : i64, tpu.core_type = #tpu.core_type<tc>, window_params = [{transform_indices = @transform_0, window_bounds = array<i64: 16, 128>}, {transform_indices = @transform_1, window_bounds = array<i64: 16, 128>}, {transform_indices = @transform_2, window_bounds = array<i64: 1, 4, 8, 128>}]} {
    %c0_i32 = arith.constant 0 : i32
    %0 = arith.cmpi eq, %arg1, %c0_i32 : i32
    %1 = arith.extui %0 : i1 to i32
    %c0_i32_0 = arith.constant 0 : i32
    %2 = arith.cmpi ne, %1, %c0_i32_0 : i32
    scf.if %2 {
      %cst = arith.constant 0.000000e+00 : f32
      %19 = vector.broadcast %cst : f32 to vector<4x8x128xf32>
      %c0 = arith.constant 0 : index
      %c0_10 = arith.constant 0 : index
      %c0_11 = arith.constant 0 : index
      %20 = vector.load %arg5[%c0, %c0_10, %c0_11] : memref<4x8x128xf32, #tpu.memory_space<vmem>>, vector<4x8x128xf32>
      tpu.vector_store %arg5[%c0, %c0_10, %c0_11], %19 {strides = array<i32>} : memref<4x8x128xf32, #tpu.memory_space<vmem>>, vector<4x8x128xf32>,
    } else {
    }
    %c1_i32 = arith.constant 1 : i32
    %3 = arith.muli %arg0, %c1_i32 : i32
    %4 = arith.addi %3, %arg1 : i32
    %c2048_i32 = arith.constant 2048 : i32
    %5 = arith.muli %4, %c2048_i32 : i32
    %c2048_i32_1 = arith.constant 2048 : i32
    %6 = arith.addi %5, %c2048_i32_1 : i32
    %c2048_i32_2 = arith.constant 2048 : i32
    %7 = arith.cmpi sle, %6, %c2048_i32_2 : i32
    %8 = arith.extui %7 : i1 to i32
    %c0_i32_3 = arith.constant 0 : i32
    %9 = arith.cmpi ne, %8, %c0_i32_3 : i32
    scf.if %9 {
      %cst = arith.constant 0.000000e+00 : f32
      %19 = vector.broadcast %cst : f32 to vector<8x128xf32>
      %c0_i32_10 = arith.constant 0 : i32
      %c16_i32 = arith.constant 16 : i32
      %20 = arith.muli %c0_i32_10, %c16_i32 : i32
      %21 = tpu.assume_multiple %20, 16 : i32
      %22 = arith.index_cast %21 : i32 to index
      %c0 = arith.constant 0 : index
      %23 = vector.load %arg2[%22, %c0] : memref<16x128xf32, #tpu.memory_space<vmem>>, vector<16x128xf32>
      %24 = arith.index_cast %21 : i32 to index
      %c0_11 = arith.constant 0 : index
      %25 = vector.load %arg3[%24, %c0_11] : memref<16x128xf32, #tpu.memory_space<vmem>>, vector<16x128xf32>
      %26 = math.absf %23 : vector<16x128xf32>
      %cst_12 = arith.constant 0.000000e+00 : f32
      %27 = vector.broadcast %cst_12 : f32 to vector<16x128xf32>
      %28 = arith.subf %27, %26 : vector<16x128xf32>
      %29 = math.exp %28 : vector<16x128xf32>
      %cst_13 = arith.constant 1.000000e+00 : f32
      %30 = vector.broadcast %cst_13 : f32 to vector<16x128xf32>
      %31 = arith.addf %30, %29 : vector<16x128xf32>
      %cst_14 = arith.constant 0.000000e+00 : f32
      %32 = vector.broadcast %cst_14 : f32 to vector<16x128xf32>
      %33 = arith.maximumf %23, %32 : vector<16x128xf32>
      %34 = arith.mulf %23, %25 : vector<16x128xf32>
      %35 = arith.subf %33, %34 : vector<16x128xf32>
      %36 = math.log %31 : vector<16x128xf32>
      %37 = arith.addf %35, %36 : vector<16x128xf32>
      %38 = tpu.reciprocal %31 {approx = true} : vector<16x128xf32> -> vector<16x128xf32>
      %39 = arith.mulf %31, %38 : vector<16x128xf32>
      %cst_15 = arith.constant 2.000000e+00 : f32
      %40 = vector.broadcast %cst_15 : f32 to vector<16x128xf32>
      %41 = arith.subf %40, %39 : vector<16x128xf32>
      %42 = arith.mulf %38, %41 : vector<16x128xf32>
      %cst_16 = arith.constant 0.000000e+00 : f32
      %43 = vector.broadcast %cst_16 : f32 to vector<16x128xf32>
      %44 = arith.cmpf oge, %23, %43 : vector<16x128xf32>
      %45 = arith.mulf %29, %42 : vector<16x128xf32>
      %46 = arith.select %44, %42, %45 : vector<16x128xi1>, vector<16x128xf32>
      %47 = vector.shape_cast %37 : vector<16x128xf32> to vector<2x8x128xf32>
      %cst_17 = arith.constant dense<0.000000e+00> : vector<8x128xf32>
      %48 = vector.multi_reduction <add>, %47, %cst_17 [0] : vector<2x8x128xf32> to vector<8x128xf32>
      %49 = vector.shape_cast %46 : vector<16x128xf32> to vector<2x8x128xf32>
      %cst_18 = arith.constant dense<0.000000e+00> : vector<8x128xf32>
      %50 = vector.multi_reduction <add>, %49, %cst_18 [0] : vector<2x8x128xf32> to vector<8x128xf32>
      %51 = vector.shape_cast %25 : vector<16x128xf32> to vector<2x8x128xf32>
      %cst_19 = arith.constant dense<0.000000e+00> : vector<8x128xf32>
      %52 = vector.multi_reduction <add>, %51, %cst_19 [0] : vector<2x8x128xf32> to vector<8x128xf32>
      %53 = arith.mulf %46, %25 : vector<16x128xf32>
      %54 = vector.shape_cast %53 : vector<16x128xf32> to vector<2x8x128xf32>
      %cst_20 = arith.constant dense<0.000000e+00> : vector<8x128xf32>
      %55 = vector.multi_reduction <add>, %54, %cst_20 [0] : vector<2x8x128xf32> to vector<8x128xf32>
      %56 = arith.addf %19, %48 : vector<8x128xf32>
      %57 = arith.addf %19, %50 : vector<8x128xf32>
      %58 = arith.addf %19, %52 : vector<8x128xf32>
      %59 = arith.addf %19, %55 : vector<8x128xf32>
      %c1_i32_21 = arith.constant 1 : i32
      %c0_22 = arith.constant 0 : index
      %c0_23 = arith.constant 0 : index
      %c0_24 = arith.constant 0 : index
      %60 = vector.load %arg5[%c0_22, %c0_23, %c0_24] : memref<4x8x128xf32, #tpu.memory_space<vmem>>, vector<1x8x128xf32>
      %61 = vector.shape_cast %60 : vector<1x8x128xf32> to vector<8x128xf32>
      %62 = arith.addf %61, %56 : vector<8x128xf32>
      %c0_25 = arith.constant 0 : index
      %c0_26 = arith.constant 0 : index
      %c0_27 = arith.constant 0 : index
      %63 = vector.load %arg5[%c0_25, %c0_26, %c0_27] : memref<4x8x128xf32, #tpu.memory_space<vmem>>, vector<1x8x128xf32>
      %64 = vector.shape_cast %63 : vector<1x8x128xf32> to vector<8x128xf32>
      %65 = vector.shape_cast %62 : vector<8x128xf32> to vector<1x8x128xf32>
      tpu.vector_store %arg5[%c0_25, %c0_26, %c0_27], %65 {strides = array<i32>} : memref<4x8x128xf32, #tpu.memory_space<vmem>>, vector<1x8x128xf32>,
      %c1 = arith.constant 1 : index
      %c0_28 = arith.constant 0 : index
      %c0_29 = arith.constant 0 : index
      %66 = vector.load %arg5[%c1, %c0_28, %c0_29] : memref<4x8x128xf32, #tpu.memory_space<vmem>>, vector<1x8x128xf32>
      %67 = vector.shape_cast %66 : vector<1x8x128xf32> to vector<8x128xf32>
      %68 = arith.addf %67, %57 : vector<8x128xf32>
      %c1_30 = arith.constant 1 : index
      %c0_31 = arith.constant 0 : index
      %c0_32 = arith.constant 0 : index
      %69 = vector.load %arg5[%c1_30, %c0_31, %c0_32] : memref<4x8x128xf32, #tpu.memory_space<vmem>>, vector<1x8x128xf32>
      %70 = vector.shape_cast %69 : vector<1x8x128xf32> to vector<8x128xf32>
      %71 = vector.shape_cast %68 : vector<8x128xf32> to vector<1x8x128xf32>
      tpu.vector_store %arg5[%c1_30, %c0_31, %c0_32], %71 {strides = array<i32>} : memref<4x8x128xf32, #tpu.memory_space<vmem>>, vector<1x8x128xf32>,
      %c2 = arith.constant 2 : index
      %c0_33 = arith.constant 0 : index
      %c0_34 = arith.constant 0 : index
      %72 = vector.load %arg5[%c2, %c0_33, %c0_34] : memref<4x8x128xf32, #tpu.memory_space<vmem>>, vector<1x8x128xf32>
      %73 = vector.shape_cast %72 : vector<1x8x128xf32> to vector<8x128xf32>
      %74 = arith.addf %73, %58 : vector<8x128xf32>
      %c2_35 = arith.constant 2 : index
      %c0_36 = arith.constant 0 : index
      %c0_37 = arith.constant 0 : index
      %75 = vector.load %arg5[%c2_35, %c0_36, %c0_37] : memref<4x8x128xf32, #tpu.memory_space<vmem>>, vector<1x8x128xf32>
      %76 = vector.shape_cast %75 : vector<1x8x128xf32> to vector<8x128xf32>
      %77 = vector.shape_cast %74 : vector<8x128xf32> to vector<1x8x128xf32>
      tpu.vector_store %arg5[%c2_35, %c0_36, %c0_37], %77 {strides = array<i32>} : memref<4x8x128xf32, #tpu.memory_space<vmem>>, vector<1x8x128xf32>,
      %c3 = arith.constant 3 : index
      %c0_38 = arith.constant 0 : index
      %c0_39 = arith.constant 0 : index
      %78 = vector.load %arg5[%c3, %c0_38, %c0_39] : memref<4x8x128xf32, #tpu.memory_space<vmem>>, vector<1x8x128xf32>
      %79 = vector.shape_cast %78 : vector<1x8x128xf32> to vector<8x128xf32>
      %80 = arith.addf %79, %59 : vector<8x128xf32>
      %c3_40 = arith.constant 3 : index
      %c0_41 = arith.constant 0 : index
      %c0_42 = arith.constant 0 : index
      %81 = vector.load %arg5[%c3_40, %c0_41, %c0_42] : memref<4x8x128xf32, #tpu.memory_space<vmem>>, vector<1x8x128xf32>
      %82 = vector.shape_cast %81 : vector<1x8x128xf32> to vector<8x128xf32>
      %83 = vector.shape_cast %80 : vector<8x128xf32> to vector<1x8x128xf32>
      tpu.vector_store %arg5[%c3_40, %c0_41, %c0_42], %83 {strides = array<i32>} : memref<4x8x128xf32, #tpu.memory_space<vmem>>, vector<1x8x128xf32>,
    } else {
    }
    %c2048_i32_4 = arith.constant 2048 : i32
    %10 = arith.cmpi slt, %5, %c2048_i32_4 : i32
    %c2048_i32_5 = arith.constant 2048 : i32
    %11 = arith.addi %5, %c2048_i32_5 : i32
    %c2048_i32_6 = arith.constant 2048 : i32
    %12 = arith.cmpi sgt, %11, %c2048_i32_6 : i32
    %13 = arith.andi %10, %12 : i1
    %14 = arith.extui %13 : i1 to i32
    %c0_i32_7 = arith.constant 0 : i32
    %15 = arith.cmpi ne, %14, %c0_i32_7 : i32
    scf.if %15 {
      %cst = arith.constant 0.000000e+00 : f32
      %19 = vector.broadcast %cst : f32 to vector<8x128xf32>
      %c0_i32_10 = arith.constant 0 : i32
      %c16_i32 = arith.constant 16 : i32
      %20 = arith.muli %c0_i32_10, %c16_i32 : i32
      %21 = tpu.assume_multiple %20, 16 : i32
      %22 = arith.index_cast %21 : i32 to index
      %c0 = arith.constant 0 : index
      %23 = vector.load %arg2[%22, %c0] : memref<16x128xf32, #tpu.memory_space<vmem>>, vector<16x128xf32>
      %24 = arith.index_cast %21 : i32 to index
      %c0_11 = arith.constant 0 : index
      %25 = vector.load %arg3[%24, %c0_11] : memref<16x128xf32, #tpu.memory_space<vmem>>, vector<16x128xf32>
      %c128_i32 = arith.constant 128 : i32
      %26 = arith.muli %21, %c128_i32 : i32
      %27 = arith.addi %5, %26 : i32
      %28 = tpu.iota {dimensions = array<i32: 0>} : vector<16x128xi32>
      %29 = tpu.iota {dimensions = array<i32: 1>} : vector<16x128xi32>
      %c128_i32_12 = arith.constant 128 : i32
      %30 = vector.broadcast %c128_i32_12 : i32 to vector<16x128xi32>
      %31 = arith.muli %28, %30 : vector<16x128xi32>
      %32 = vector.broadcast %27 : i32 to vector<16x128xi32>
      %33 = arith.addi %32, %31 : vector<16x128xi32>
      %34 = arith.addi %33, %29 : vector<16x128xi32>
      %c2048_i32_13 = arith.constant 2048 : i32
      %35 = vector.broadcast %c2048_i32_13 : i32 to vector<16x128xi32>
      %36 = arith.cmpi slt, %34, %35 : vector<16x128xi32>
      %cst_14 = arith.constant -1.000000e+09 : f32
      %37 = vector.broadcast %cst_14 : f32 to vector<16x128xf32>
      %38 = arith.select %36, %23, %37 : vector<16x128xi1>, vector<16x128xf32>
      %cst_15 = arith.constant 0.000000e+00 : f32
      %39 = vector.broadcast %cst_15 : f32 to vector<16x128xf32>
      %40 = arith.select %36, %25, %39 : vector<16x128xi1>, vector<16x128xf32>
      %41 = math.absf %38 : vector<16x128xf32>
      %cst_16 = arith.constant 0.000000e+00 : f32
      %42 = vector.broadcast %cst_16 : f32 to vector<16x128xf32>
      %43 = arith.subf %42, %41 : vector<16x128xf32>
      %44 = math.exp %43 : vector<16x128xf32>
      %cst_17 = arith.constant 1.000000e+00 : f32
      %45 = vector.broadcast %cst_17 : f32 to vector<16x128xf32>
      %46 = arith.addf %45, %44 : vector<16x128xf32>
      %cst_18 = arith.constant 0.000000e+00 : f32
      %47 = vector.broadcast %cst_18 : f32 to vector<16x128xf32>
      %48 = arith.maximumf %38, %47 : vector<16x128xf32>
      %49 = arith.mulf %38, %40 : vector<16x128xf32>
      %50 = arith.subf %48, %49 : vector<16x128xf32>
      %51 = math.log %46 : vector<16x128xf32>
      %52 = arith.addf %50, %51 : vector<16x128xf32>
      %53 = tpu.reciprocal %46 {approx = true} : vector<16x128xf32> -> vector<16x128xf32>
      %54 = arith.mulf %46, %53 : vector<16x128xf32>
      %cst_19 = arith.constant 2.000000e+00 : f32
      %55 = vector.broadcast %cst_19 : f32 to vector<16x128xf32>
      %56 = arith.subf %55, %54 : vector<16x128xf32>
      %57 = arith.mulf %53, %56 : vector<16x128xf32>
      %cst_20 = arith.constant 0.000000e+00 : f32
      %58 = vector.broadcast %cst_20 : f32 to vector<16x128xf32>
      %59 = arith.cmpf oge, %38, %58 : vector<16x128xf32>
      %60 = arith.mulf %44, %57 : vector<16x128xf32>
      %61 = arith.select %59, %57, %60 : vector<16x128xi1>, vector<16x128xf32>
      %62 = vector.shape_cast %52 : vector<16x128xf32> to vector<2x8x128xf32>
      %cst_21 = arith.constant dense<0.000000e+00> : vector<8x128xf32>
      %63 = vector.multi_reduction <add>, %62, %cst_21 [0] : vector<2x8x128xf32> to vector<8x128xf32>
      %64 = vector.shape_cast %61 : vector<16x128xf32> to vector<2x8x128xf32>
      %cst_22 = arith.constant dense<0.000000e+00> : vector<8x128xf32>
      %65 = vector.multi_reduction <add>, %64, %cst_22 [0] : vector<2x8x128xf32> to vector<8x128xf32>
      %66 = vector.shape_cast %40 : vector<16x128xf32> to vector<2x8x128xf32>
      %cst_23 = arith.constant dense<0.000000e+00> : vector<8x128xf32>
      %67 = vector.multi_reduction <add>, %66, %cst_23 [0] : vector<2x8x128xf32> to vector<8x128xf32>
      %68 = arith.mulf %61, %40 : vector<16x128xf32>
      %69 = vector.shape_cast %68 : vector<16x128xf32> to vector<2x8x128xf32>
      %cst_24 = arith.constant dense<0.000000e+00> : vector<8x128xf32>
      %70 = vector.multi_reduction <add>, %69, %cst_24 [0] : vector<2x8x128xf32> to vector<8x128xf32>
      %71 = arith.addf %19, %63 : vector<8x128xf32>
      %72 = arith.addf %19, %65 : vector<8x128xf32>
      %73 = arith.addf %19, %67 : vector<8x128xf32>
      %74 = arith.addf %19, %70 : vector<8x128xf32>
      %c1_i32_25 = arith.constant 1 : i32
      %c0_26 = arith.constant 0 : index
      %c0_27 = arith.constant 0 : index
      %c0_28 = arith.constant 0 : index
      %75 = vector.load %arg5[%c0_26, %c0_27, %c0_28] : memref<4x8x128xf32, #tpu.memory_space<vmem>>, vector<1x8x128xf32>
      %76 = vector.shape_cast %75 : vector<1x8x128xf32> to vector<8x128xf32>
      %77 = arith.addf %76, %71 : vector<8x128xf32>
      %c0_29 = arith.constant 0 : index
      %c0_30 = arith.constant 0 : index
      %c0_31 = arith.constant 0 : index
      %78 = vector.load %arg5[%c0_29, %c0_30, %c0_31] : memref<4x8x128xf32, #tpu.memory_space<vmem>>, vector<1x8x128xf32>
      %79 = vector.shape_cast %78 : vector<1x8x128xf32> to vector<8x128xf32>
      %80 = vector.shape_cast %77 : vector<8x128xf32> to vector<1x8x128xf32>
      tpu.vector_store %arg5[%c0_29, %c0_30, %c0_31], %80 {strides = array<i32>} : memref<4x8x128xf32, #tpu.memory_space<vmem>>, vector<1x8x128xf32>,
      %c1 = arith.constant 1 : index
      %c0_32 = arith.constant 0 : index
      %c0_33 = arith.constant 0 : index
      %81 = vector.load %arg5[%c1, %c0_32, %c0_33] : memref<4x8x128xf32, #tpu.memory_space<vmem>>, vector<1x8x128xf32>
      %82 = vector.shape_cast %81 : vector<1x8x128xf32> to vector<8x128xf32>
      %83 = arith.addf %82, %72 : vector<8x128xf32>
      %c1_34 = arith.constant 1 : index
      %c0_35 = arith.constant 0 : index
      %c0_36 = arith.constant 0 : index
      %84 = vector.load %arg5[%c1_34, %c0_35, %c0_36] : memref<4x8x128xf32, #tpu.memory_space<vmem>>, vector<1x8x128xf32>
      %85 = vector.shape_cast %84 : vector<1x8x128xf32> to vector<8x128xf32>
      %86 = vector.shape_cast %83 : vector<8x128xf32> to vector<1x8x128xf32>
      tpu.vector_store %arg5[%c1_34, %c0_35, %c0_36], %86 {strides = array<i32>} : memref<4x8x128xf32, #tpu.memory_space<vmem>>, vector<1x8x128xf32>,
      %c2 = arith.constant 2 : index
      %c0_37 = arith.constant 0 : index
      %c0_38 = arith.constant 0 : index
      %87 = vector.load %arg5[%c2, %c0_37, %c0_38] : memref<4x8x128xf32, #tpu.memory_space<vmem>>, vector<1x8x128xf32>
      %88 = vector.shape_cast %87 : vector<1x8x128xf32> to vector<8x128xf32>
      %89 = arith.addf %88, %73 : vector<8x128xf32>
      %c2_39 = arith.constant 2 : index
      %c0_40 = arith.constant 0 : index
      %c0_41 = arith.constant 0 : index
      %90 = vector.load %arg5[%c2_39, %c0_40, %c0_41] : memref<4x8x128xf32, #tpu.memory_space<vmem>>, vector<1x8x128xf32>
      %91 = vector.shape_cast %90 : vector<1x8x128xf32> to vector<8x128xf32>
      %92 = vector.shape_cast %89 : vector<8x128xf32> to vector<1x8x128xf32>
      tpu.vector_store %arg5[%c2_39, %c0_40, %c0_41], %92 {strides = array<i32>} : memref<4x8x128xf32, #tpu.memory_space<vmem>>, vector<1x8x128xf32>,
      %c3 = arith.constant 3 : index
      %c0_42 = arith.constant 0 : index
      %c0_43 = arith.constant 0 : index
      %93 = vector.load %arg5[%c3, %c0_42, %c0_43] : memref<4x8x128xf32, #tpu.memory_space<vmem>>, vector<1x8x128xf32>
      %94 = vector.shape_cast %93 : vector<1x8x128xf32> to vector<8x128xf32>
      %95 = arith.addf %94, %74 : vector<8x128xf32>
      %c3_44 = arith.constant 3 : index
      %c0_45 = arith.constant 0 : index
      %c0_46 = arith.constant 0 : index
      %96 = vector.load %arg5[%c3_44, %c0_45, %c0_46] : memref<4x8x128xf32, #tpu.memory_space<vmem>>, vector<1x8x128xf32>
      %97 = vector.shape_cast %96 : vector<1x8x128xf32> to vector<8x128xf32>
      %98 = vector.shape_cast %95 : vector<8x128xf32> to vector<1x8x128xf32>
      tpu.vector_store %arg5[%c3_44, %c0_45, %c0_46], %98 {strides = array<i32>} : memref<4x8x128xf32, #tpu.memory_space<vmem>>, vector<1x8x128xf32>,
    } else {
    }
    %c0_i32_8 = arith.constant 0 : i32
    %16 = arith.cmpi eq, %arg1, %c0_i32_8 : i32
    %17 = arith.extui %16 : i1 to i32
    %c0_i32_9 = arith.constant 0 : i32
    %18 = arith.cmpi ne, %17, %c0_i32_9 : i32
    scf.if %18 {
      %c0 = arith.constant 0 : index
      %c0_10 = arith.constant 0 : index
      %c0_11 = arith.constant 0 : index
      %19 = vector.load %arg5[%c0, %c0_10, %c0_11] : memref<4x8x128xf32, #tpu.memory_space<vmem>>, vector<4x8x128xf32>
      %c0_12 = arith.constant 0 : index
      %c0_13 = arith.constant 0 : index
      %c0_14 = arith.constant 0 : index
      %c0_15 = arith.constant 0 : index
      %20 = vector.load %arg4[%c0_12, %c0_13, %c0_14, %c0_15] : memref<1x4x8x128xf32, #tpu.memory_space<vmem>>, vector<1x4x8x128xf32>
      %21 = vector.shape_cast %20 : vector<1x4x8x128xf32> to vector<4x8x128xf32>
      %22 = vector.shape_cast %19 : vector<4x8x128xf32> to vector<1x4x8x128xf32>
      tpu.vector_store %arg4[%c0_12, %c0_13, %c0_14, %c0_15], %22 {strides = array<i32>} : memref<1x4x8x128xf32, #tpu.memory_space<vmem>>, vector<1x4x8x128xf32>,
    } else {
    }
    return
  }
  func.func @transform_0(%arg0: i32, %arg1: i32) -> (i32, i32) {
    %c1_i32 = arith.constant 1 : i32
    %0 = arith.muli %arg0, %c1_i32 : i32
    %1 = arith.addi %0, %arg1 : i32
    %c0_i32 = arith.constant 0 : i32
    %2 = arith.minsi %1, %c0_i32 : i32
    %c0_i32_0 = arith.constant 0 : i32
    %c0_i32_1 = arith.constant 0 : i32
    return %2, %c0_i32_0 : i32, i32
  }
  func.func @transform_1(%arg0: i32, %arg1: i32) -> (i32, i32) {
    %c1_i32 = arith.constant 1 : i32
    %0 = arith.muli %arg0, %c1_i32 : i32
    %1 = arith.addi %0, %arg1 : i32
    %c0_i32 = arith.constant 0 : i32
    %2 = arith.minsi %1, %c0_i32 : i32
    %c0_i32_0 = arith.constant 0 : i32
    %c0_i32_1 = arith.constant 0 : i32
    return %2, %c0_i32_0 : i32, i32
  }
  func.func @transform_2(%arg0: i32, %arg1: i32) -> (i32, i32, i32, i32) {
    %c0_i32 = arith.constant 0 : i32
    %c0_i32_0 = arith.constant 0 : i32
    %c0_i32_1 = arith.constant 0 : i32
    %c0_i32_2 = arith.constant 0 : i32
    return %arg0, %c0_i32, %c0_i32_0, %c0_i32_1 : i32, i32, i32, i32
  }
}

</mosaic_0001>

<bundles_post_ra>
// kernel: tpu_custom_call.1
= control target key start
LH: loop header
LB: loop body
LE: loop exit
PB: predicated region body
PF: predicated region fallthrough
CT: control target
= control target key end

     0   :  { %7 = vsyncpa [#allocation4], 0  ;;  %s418_s0 = inlined_call_operand.hbm [shape: f32[16,128], index: 0, kind: input, shape index: {}]   ;;  %s419_s1 = inlined_call_operand.hbm [shape: f32[16,128], index: 1, kind: input, shape index: {}]   ;;  %s420_s2 = inlined_call_operand.hbm [shape: f32[1,4,8,128], index: 2, kind: output, shape index: {}]  }
   0x1   :  { %8 = vsyncpa [#allocation7], 0 }
   0x2   :  { %9 = vsyncpa [#allocation5], 0  ;;  %s353_s9 = smov [#allocation3]   ;;  %s281_s13 = scalar_lea.hbm %s418_s0, 256 }
   0x3   :  { %s21_s10 = sshll.u32 %s353_s9, 4  ;;  %p282_p0 = scmp.ne.s32.totalorder %s418_s0, %s281_s13  ;;  %s22_s10 = int_to_ptr.vmem [resolvable:$true] %s21_s10 }
   0x4   :  { %p285_p1 = scmp.lt.u32.totalorder %s281_s13, %s418_s0 }
   0x6   :  { %p287_p2 = pnand %p285_p1, %p282_p0 }
   0x8   :  { %290 = shalt.err (!%p287_p2)
}
   0x9   :  { %s291_s18 = scalar_lea.vmem %s22_s10, 256  ;;  %p296_p4 = scmp.lt.s32.totalorder %s22_s10, %s22_s10 }
   0xa   :  { %p292_p3 = scmp.ne.s32.totalorder %s22_s10, %s291_s18  ;;  %p297_p5 = scmp.lt.s32.totalorder %s291_s18, %s291_s18 }
   0xc   :  { %p298_p6 = por %p297_p5, %p296_p4 }
   0xe   :  { %p299_p7 = pnand %p298_p6, %p292_p3 }
  0x10   :  { %302 = shalt.err (!%p299_p7)
}
  0x11   :  { %s354_s19 = smov 128   ;;  %s355_s20 = smov 8  }
  0x12   :  { %27 = dma.hbm_to_vmem [thread:$0]  %s418_s0, 256, %s22_s10, [#allocation4], %s354_s19, %s354_s19, %s355_s20  }
  0x13   :  { %s356_s23 = smov [#allocation6]   ;;  %s303_s27 = scalar_lea.hbm %s419_s1, 256 }
  0x14   :  { %s39_s24 = sshll.u32 %s356_s23, 4  ;;  %p304_p8 = scmp.ne.s32.totalorder %s419_s1, %s303_s27  ;;  %s40_s24 = int_to_ptr.vmem [resolvable:$true] %s39_s24 }
  0x15   :  { %p307_p9 = scmp.lt.u32.totalorder %s303_s27, %s419_s1 }
  0x17   :  { %p309_p10 = pnand %p307_p9, %p304_p8 }
  0x19   :  { %312 = shalt.err (!%p309_p10)
}
  0x1a   :  { %s313_s4 = scalar_lea.vmem %s40_s24, 256  ;;  %p318_p12 = scmp.lt.s32.totalorder %s40_s24, %s40_s24 }
  0x1b   :  { %p314_p11 = scmp.ne.s32.totalorder %s40_s24, %s313_s4  ;;  %p319_p13 = scmp.lt.s32.totalorder %s313_s4, %s313_s4 }
  0x1d   :  { %p320_p0 = por %p319_p13, %p318_p12 }
  0x1f   :  { %p321_p1 = pnand %p320_p0, %p314_p11 }
  0x21   :  { %324 = shalt.err (!%p321_p1)
}
  0x22   :  { %45 = dma.hbm_to_vmem [thread:$0]  %s419_s1, 256, %s40_s24, [#allocation7], %s354_s19, %s354_s19, %s355_s20  }
  0x23   :  { %347 = dma.done.wait [#allocation4], 256  }
  0x24   :  { %348 = vsyncadd [#allocation4], 4294967040 }
  0x25   :  { %349 = dma.done.wait [#allocation7], 256  }
  0x26   :  { %350 = vsyncadd [#allocation7], 4294967040  ;;  %v75_v0 = vld [vmem:[#allocation3] sm:$0xff]  ;;  %v76_v1 = vld [vmem:[#allocation3 + $0x8] sm:$0xff]  ;;  %s357_s1 = smov [#allocation8]  }
  0x27   :  { %v79_v2 = vand.u32 2147483647, %v75_v0  ;;  %v80_v3 = vand.u32 2147483647, %v76_v1  ;;  %v77_v4 = vld [vmem:[#allocation6] sm:$0xff]  ;;  %v78_v5 = vld [vmem:[#allocation6 + $0x8] sm:$0xff] }
  0x28   :  { %v117_v8 = vadd.f32 %v78_v5, %v77_v4  ;;  %v89_v15 = vmax.f32 %v75_v0, 0.0  ;;  %v91_v16 = vmul.f32 %v77_v4, %v75_v0  ;;  %v90_v17 = vmax.f32 %v76_v1, 0.0  ;;  %s247_s6 = sshll.u32 %s357_s1, 4  ;;  %s248_s6 = int_to_ptr.vmem [resolvable:$true] %s247_s6 }
  0x29   :  { %v81_v6 = vsub.f32 0.0, %v79_v2  ;;  %v82_v7 = vsub.f32 0.0, %v80_v3  ;;  %v92_v18 = vmul.f32 %v78_v5, %v76_v1  ;;  %vm109_vm0 = vcmp.ge.f32.partialorder %v75_v0, 0.0  ;;  %s325_s7 = scalar_lea.vmem %s248_s6, 512  ;;  %p330_p3 = scmp.lt.s32.totalorder %s248_s6, %s248_s6 }
  0x2a   :  { %240 = vst [vmem:[#allocation8 + $0x10] sm:$0xff] %v117_v8  ;;  %v93_v19 = vsub.f32 %v89_v15, %v91_v16  ;;  %vm110_vm1 = vcmp.ge.f32.partialorder %v76_v1, 0.0  ;;  %p326_p2 = scmp.ne.s32.totalorder %s248_s6, %s325_s7  ;;  %p331_p4 = scmp.lt.s32.totalorder %s325_s7, %s325_s7 }
  0x2b   :  { %v83_v9 = vmul.f32 1.442695, %v81_v6  ;;  %v85_v10 = vmul.f32 1.442695, %v82_v7  ;;  %v94_v21 = vsub.f32 %v90_v17, %v92_v18 }
  0x2c   :  { %p332_p5 = por %p331_p4, %p330_p3 }
  0x2d   :  { %269 = vpow2.f32 %v83_v9 }
  0x2e   :  { %271 = vpow2.f32 %v85_v10  ;;  %p333_p6 = pnand %p332_p5, %p326_p2 }
  0x37   :  { %v270_v11 = vpop.eup %269 }
  0x38   :  { %v272_v12 = vpop.eup %271  ;;  %v87_v13 = vadd.f32 1.0, %v270_v11 }
  0x39   :  { %v88_v14 = vadd.f32 1.0, %v272_v12 }
  0x3a   :  { %273 = vlog2.f32 %v87_v13 }
  0x3b   :  { %275 = vlog2.f32 %v88_v14 }
  0x3c   :  { %277 = vrcp.f32 %v87_v13 }
  0x3d   :  { %279 = vrcp.f32 %v88_v14 }
  0x44   :  { %v274_v20 = vpop.eup %273 }
  0x45   :  { %v276_v22 = vpop.eup %275  ;;  %v96_v23 = vmul.f32 0.6931472, %v274_v20 }
  0x46   :  { %v278_v24 = vpop.eup %277  ;;  %v98_v25 = vmul.f32 0.6931472, %v276_v22 }
  0x47   :  { %v280_v26 = vpop.eup %279  ;;  %v99_v27 = vadd.f32 %v96_v23, %v93_v19  ;;  %v103_v28 = vmul.f32 %v278_v24, %v87_v13 }
  0x48   :  { %v100_v29 = vadd.f32 %v98_v25, %v94_v21  ;;  %v104_v30 = vmul.f32 %v280_v26, %v88_v14 }
  0x49   :  { %v105_v31 = vsub.f32 2.0, %v103_v28 }
  0x4a   :  { %v115_v32 = vadd.f32 %v100_v29, %v99_v27  ;;  %v106_v33 = vsub.f32 2.0, %v104_v30 }
  0x4b   :  { %v107_v34 = vmul.f32 %v278_v24, %v105_v31 }
  0x4c   :  { %238 = vst [vmem:[#allocation8] sm:$0xff] %v115_v32  ;;  %v108_v35 = vmul.f32 %v280_v26, %v106_v33 }
  0x4d   :  { %v111_v36 = vmul.f32 %v270_v11, %v107_v34 }
  0x4e   :  { %v112_v37 = vmul.f32 %v272_v12, %v108_v35 }
  0x4f   :  { %v113_v38 = vsel %vm109_vm0, %v107_v34, %v111_v36 }
  0x50   :  { %v114_v39 = vsel %vm110_vm1, %v108_v35, %v112_v37  ;;  %v118_v40 = vmul.f32 %v113_v38, %v77_v4 }
  0x51   :  { %v116_v41 = vadd.f32 %v114_v39, %v113_v38  ;;  %v119_v42 = vmul.f32 %v114_v39, %v78_v5 }
  0x53   :  { %239 = vst [vmem:[#allocation8 + $0x8] sm:$0xff] %v116_v41  ;;  %v120_v43 = vadd.f32 %v119_v42, %v118_v40 }
  0x55   :  { %241 = vst [vmem:[#allocation8 + $0x18] sm:$0xff] %v120_v43 }
  0x56   :  { %336 = shalt.err (!%p333_p6)
}
  0x57   :  { %s337_s10 = scalar_lea.hbm %s420_s2, 512 }
  0x58   :  { %p338_p7 = scmp.ne.s32.totalorder %s420_s2, %s337_s10  ;;  %p341_p8 = scmp.lt.u32.totalorder %s337_s10, %s420_s2 }
  0x5a   :  { %p343_p9 = pnand %p341_p8, %p338_p7 }
  0x5c   :  { %346 = shalt.err (!%p343_p9)
}
  0x5d   :  { %253 = dma.vmem_to_hbm [thread:$0]  %s248_s6, 512, %s420_s2, [#allocation5], %s354_s19, %s354_s19, %s355_s20  }
  0x5e   :  { %351 = dma.done.wait [#allocation5], 512  }
  0x5f   :  { %352 = vsyncadd [#allocation5], 4294966784 }
  0x60   :  { %257 = vsyncpa [#allocation4], 1 }
  0x61   :  { %258 = vsyncpa [#allocation7], 1 }
  0x62   :  { %259 = vsyncpa [#allocation5], 1 }

</bundles_post_ra>
